<compile_context>
chip_gen: v5e
topology: v5e:2x2
jax: 0.10.0
libtpu: 0.0.40
codegen_flags: <defaults>
</compile_context>

<pallas_src>
import functools

import jax
import jax.numpy as jnp
from jax.experimental import pallas as pl
from jax.experimental.pallas import tpu as pltpu


def _round_up(a, m):
    return ((a + m - 1) // m) * m


def _vmem_capacity_bytes():
    try:
        info = pltpu.get_tpu_info()
        cap = getattr(info, "vmem_capacity_bytes", None)
        if cap:
            return int(cap)
    except Exception:
        pass
    return 64 * 1024 * 1024  # v7x floor -- safe on every generation


def nvm_kernel(x_ref, eps_ref,
               w_he_ref, b_he_ref,
               w_eh_ref, b_eh_ref,
               w_hd_ref, b_hd_ref,
               w_dh_ref, b_dh_ref,
               out_ref, *, split_store):
    """One batch tile of the NVM forward.

    x_ref   : [TB, x_dim]        bf16 (MXU input, streamed)
    eps_ref : [TB, x_dim]        bf16 (elementwise only, streamed)
    w_he    : [x_dim, h_dim]     bf16    b_he : [1, h_dim]     f32
    w_eh    : [h_dim, 2*x_dim]   bf16    b_eh : [1, 2*x_dim]   f32   (mu_e|logvar_e fused)
    w_hd    : [x_dim, h_dim]     bf16    b_hd : [1, h_dim]     f32
    w_dh    : [h_dim, 2*x_dim]   bf16    b_dh : [1, 2*x_dim]   f32   (mu_d|logvar_d fused)
    out_ref : [TB, 4*x_dim]      out_dtype, packed [mu_e | logvar_e | mu_d | logvar_d]
    """
    x = x_ref[...]
    x_dim = x.shape[-1]
    mxu_dtype = w_he_ref.dtype

    # --- encode: hidden (f32 accumulation, f32 elementwise) ---
    h_e = jnp.dot(x, w_he_ref[...], preferred_element_type=jnp.float32) + b_he_ref[...]
    h_e = jnp.maximum(h_e, 0.0)

    # fused encoder heads -> [TB, 2*x_dim] = [mu_e | logvar_e]
    enc = jnp.dot(h_e.astype(mxu_dtype), w_eh_ref[...],
                  preferred_element_type=jnp.float32) + b_eh_ref[...]
    mu_e = enc[:, :x_dim]
    logvar_e = enc[:, x_dim:]

    # --- reparameterize: z = mu + exp(logvar/2) * eps  (f32 on VPU/EUP) ---
    eps = eps_ref[...].astype(jnp.float32)
    z = mu_e + jnp.exp(logvar_e * 0.5) * eps

    # --- decode ---
    h_d = jnp.dot(z.astype(mxu_dtype), w_hd_ref[...],
                  preferred_element_type=jnp.float32) + b_hd_ref[...]
    h_d = jnp.maximum(h_d, 0.0)

    # fused decoder heads -> [TB, 2*x_dim] = [mu_d | logvar_d]
    dec = jnp.dot(h_d.astype(mxu_dtype), w_dh_ref[...],
                  preferred_element_type=jnp.float32) + b_dh_ref[...]

    if split_store:
        # lane-aligned halves: write directly, no concat temp in VMEM
        out_ref[:, :2 * x_dim] = enc.astype(out_ref.dtype)
        out_ref[:, 2 * x_dim:] = dec.astype(out_ref.dtype)
    else:
        # small dims: one packed store keeps the writeback as dense as possible
        out_ref[...] = jnp.concatenate([enc, dec], axis=-1).astype(out_ref.dtype)


def prepare_params(p, mxu_dtype=jnp.bfloat16):
    """Build the kernel-ready param pytree ONCE (fused heads, pre-cast dtypes)."""
    return {
        "w_he": p["w_he"].astype(mxu_dtype),
        "b_he": p["b_he"].astype(jnp.float32),
        "w_eh": jnp.concatenate([p["w_mue"], p["w_lve"]], axis=1).astype(mxu_dtype),
        "b_eh": jnp.concatenate([p["b_mue"], p["b_lve"]], axis=1).astype(jnp.float32),
        "w_hd": p["w_hd"].astype(mxu_dtype),
        "b_hd": p["b_hd"].astype(jnp.float32),
        "w_dh": jnp.concatenate([p["w_mud"], p["w_lvd"]], axis=1).astype(mxu_dtype),
        "b_dh": jnp.concatenate([p["b_mud"], p["b_lvd"]], axis=1).astype(jnp.float32),
    }


def _choose_tile(B, x_dim, weight_bytes, out_itemsize, block_b):
    """Derive (TB, vmem_limit_bytes) from the chip's VMEM capacity."""
    vmem_cap = _vmem_capacity_bytes()
    vmem_budget = (vmem_cap * 3) // 4          # headroom for compiler scratch
    # per-row streaming bytes, double-buffered: x (bf16) + eps (bf16) + packed out
    stream_per_row = 2 * (2 * x_dim + 2 * x_dim + out_itemsize * 4 * x_dim)
    avail = max(vmem_budget - 2 * weight_bytes, stream_per_row * 16)
    tb_budget = max(16, (avail // stream_per_row) // 16 * 16)

    TB = min(tb_budget, _round_up(block_b, 16), _round_up(B, 8))
    if B > 16:
        # keep >=2 grid steps so the "parallel" batch axis can shard across
        # both TensorCores on 2-TC chips (v7x).
        TB = min(TB, _round_up(pl.cdiv(B, 2), 8))
    TB = max(TB, 8)

    needed = 2 * weight_bytes + TB * stream_per_row + (1 << 20)
    vmem_limit = int(min(max(2 * needed, 32 * 1024 * 1024), vmem_budget))
    return TB, vmem_limit


def nvm_forward(x, eps, kparams, *, block_b=4096, out_dtype=jnp.bfloat16):
    """x: [B, x_dim], eps: [B, x_dim].  Returns (mu_e, logvar_e, mu_d, logvar_d).

    kparams is the output of prepare_params (fused heads, pre-cast).
    out_dtype=jnp.bfloat16 minimizes HBM writeback; use jnp.float32 if the
    downstream loss needs full-precision logvar.
    """
    B, x_dim = x.shape
    mxu_dtype = kparams["w_he"].dtype
    h_dim = kparams["w_he"].shape[1]

    x_m = x.astype(mxu_dtype)
    eps_m = eps.astype(mxu_dtype)          # bf16 eps: halves the eps read stream

    weight_bytes = sum(int(a.size) * a.dtype.itemsize for a in kparams.values())
    out_itemsize = jnp.dtype(out_dtype).itemsize
    TB, vmem_limit = _choose_tile(B, x_dim, weight_bytes, out_itemsize, block_b)
    grid = (pl.cdiv(B, TB),)               # partial last block handled by Pallas

    split_store = (2 * x_dim) % 128 == 0
    kern = functools.partial(nvm_kernel, split_store=split_store)

    def pinned(shape):
        # Constant block index -> DMA'd once, stays VMEM-resident across steps.
        return pl.BlockSpec(shape, lambda i: (0, 0))

    in_specs = [
        pl.BlockSpec((TB, x_dim), lambda i: (i, 0)),          # x   (bf16, streamed)
        pl.BlockSpec((TB, x_dim), lambda i: (i, 0)),          # eps (bf16, streamed)
        pinned((x_dim, h_dim)), pinned((1, h_dim)),           # h_e weight / bias
        pinned((h_dim, 2 * x_dim)), pinned((1, 2 * x_dim)),   # fused encoder heads
        pinned((x_dim, h_dim)), pinned((1, h_dim)),           # h_d weight / bias
        pinned((h_dim, 2 * x_dim)), pinned((1, 2 * x_dim)),   # fused decoder heads
    ]
    out_specs = pl.BlockSpec((TB, 4 * x_dim), lambda i: (i, 0))
    out_shape = jax.ShapeDtypeStruct((B, 4 * x_dim), out_dtype)

    cost = pl.CostEstimate(
        flops=12 * B * x_dim * h_dim,          # 2 hidden + 2 fused-head matmuls
        transcendentals=B * x_dim,             # exp in the reparameterization
        bytes_accessed=(int(x_m.size) * 2
                        + int(eps_m.size) * 2
                        + weight_bytes
                        + B * 4 * x_dim * out_itemsize),
    )

    packed = pl.pallas_call(
        kern,
        grid=grid,
        in_specs=in_specs,
        out_specs=out_specs,
        out_shape=out_shape,
        compiler_params=pltpu.CompilerParams(
            dimension_semantics=("parallel",),
            vmem_limit_bytes=vmem_limit,
        ),
        cost_estimate=cost,
    )(x_m, eps_m,
      kparams["w_he"], kparams["b_he"], kparams["w_eh"], kparams["b_eh"],
      kparams["w_hd"], kparams["b_hd"], kparams["w_dh"], kparams["b_dh"])

    mu_e = packed[:, 0 * x_dim:1 * x_dim]
    logvar_e = packed[:, 1 * x_dim:2 * x_dim]
    mu_d = packed[:, 2 * x_dim:3 * x_dim]
    logvar_d = packed[:, 3 * x_dim:4 * x_dim]
    return mu_e, logvar_e, mu_d, logvar_d


def init_params(key, x_dim, h_dim):
    """Deterministic init mimicking nn.Linear shapes.

    Weights are stored already transposed to [in, out] for direct x @ W use.
    Biases are stored as [1, out] for TPU-friendly 2-D layout.
    """
    ks = jax.random.split(key, 12)

    def lin(kw, kb, fan_in, fan_out):
        bound = 1.0 / jnp.sqrt(fan_in)
        w = jax.random.uniform(kw, (fan_in, fan_out), jnp.float32, -bound, bound)
        b = jax.random.uniform(kb, (1, fan_out), jnp.float32, -bound, bound)
        return w, b

    p = {}
    p["w_he"], p["b_he"] = lin(ks[0], ks[1], x_dim, h_dim)
    p["w_mue"], p["b_mue"] = lin(ks[2], ks[3], h_dim, x_dim)
    p["w_lve"], p["b_lve"] = lin(ks[4], ks[5], h_dim, x_dim)
    p["w_hd"], p["b_hd"] = lin(ks[6], ks[7], x_dim, h_dim)
    p["w_mud"], p["b_mud"] = lin(ks[8], ks[9], h_dim, x_dim)
    p["w_lvd"], p["b_lvd"] = lin(ks[10], ks[11], h_dim, x_dim)
    return p


def nvm_reference(x, eps, p, mxu_dtype=None):
    """Pure-JAX reference of the PyTorch forward.

    If mxu_dtype is given, matmul inputs (and eps) are cast to it, matching the
    kernel's bf16-in / f32-accumulate MXU path; otherwise it is full f32.
    """
    def dot(a, w):
        if mxu_dtype is not None:
            a = a.astype(mxu_dtype)
            w = w.astype(mxu_dtype)
        return jnp.dot(a, w, preferred_element_type=jnp.float32)

    if mxu_dtype is not None:
        eps = eps.astype(mxu_dtype).astype(jnp.float32)

    h_e = jnp.maximum(dot(x, p["w_he"]) + p["b_he"], 0.0)
    mu_e = dot(h_e, p["w_mue"]) + p["b_mue"]
    logvar_e = dot(h_e, p["w_lve"]) + p["b_lve"]
    z = mu_e + jnp.exp(logvar_e * 0.5) * eps
    h_d = jnp.maximum(dot(z, p["w_hd"]) + p["b_hd"], 0.0)
    mu_d = dot(h_d, p["w_mud"]) + p["b_mud"]
    logvar_d = dot(h_d, p["w_lvd"]) + p["b_lvd"]
    return mu_e, logvar_e, mu_d, logvar_d


if __name__ == "__main__":
    x_dim, h_dim, batch = 16, 32, 8

    key = jax.random.PRNGKey(0)
    k_param, k_x, k_eps = jax.random.split(key, 3)

    params = init_params(k_param, x_dim, h_dim)
    kparams = prepare_params(params)                   # fused + pre-cast, once

    x = jax.random.normal(k_x, (batch, x_dim), jnp.float32)
    eps = jax.random.normal(k_eps, (batch, x_dim), jnp.float32)

    refs = nvm_reference(x, eps, params, mxu_dtype=jnp.bfloat16)

    # f32-output path: tight comparison vs the matched-precision reference.
    outs_f32 = jax.block_until_ready(
        nvm_forward(x, eps, kparams, out_dtype=jnp.float32))
    for o, r in zip(outs_f32, refs):
        assert o.shape == (batch, x_dim)
        assert jnp.allclose(o, r, atol=1e-3, rtol=1e-3), "mismatch (f32 out)"

    # default bf16-output path (lowest HBM traffic): looser tol from final rounding.
    outs_bf16 = jax.block_until_ready(nvm_forward(x, eps, kparams))
    for o, r in zip(outs_bf16, refs):
        assert o.shape == (batch, x_dim)
        assert o.dtype == jnp.bfloat16
        assert jnp.allclose(o.astype(jnp.float32), r, atol=3e-2, rtol=3e-2), \
            "mismatch (bf16 out)"

    # multi-tile grid with a partial last block (no wrapper-side padding pass).
    batch2 = 40
    x2 = jax.random.normal(jax.random.PRNGKey(1), (batch2, x_dim), jnp.float32)
    eps2 = jax.random.normal(jax.random.PRNGKey(2), (batch2, x_dim), jnp.float32)
    outs2 = jax.block_until_ready(
        nvm_forward(x2, eps2, kparams, block_b=16, out_dtype=jnp.float32))
    refs2 = nvm_reference(x2, eps2, params, mxu_dtype=jnp.bfloat16)
    for o, r in zip(outs2, refs2):
        assert o.shape == (batch2, x_dim)
        assert jnp.allclose(o, r, atol=1e-3, rtol=1e-3), "mismatch on tiled batch"

    print("KERNEL_OK")
</pallas_src>

<mosaic_0001>
module attributes {stable_mosaic.version = 11 : i64} {
  func.func @nvm_kernel(%arg0: i32, %arg1: memref<8x16xbf16, #tpu.memory_space<vmem>>, %arg2: memref<8x16xbf16, #tpu.memory_space<vmem>>, %arg3: memref<16x32xbf16, #tpu.memory_space<vmem>>, %arg4: memref<1x32xf32, #tpu.memory_space<vmem>>, %arg5: memref<32x32xbf16, #tpu.memory_space<vmem>>, %arg6: memref<1x32xf32, #tpu.memory_space<vmem>>, %arg7: memref<16x32xbf16, #tpu.memory_space<vmem>>, %arg8: memref<1x32xf32, #tpu.memory_space<vmem>>, %arg9: memref<32x32xbf16, #tpu.memory_space<vmem>>, %arg10: memref<1x32xf32, #tpu.memory_space<vmem>>, %arg11: memref<8x64xf32, #tpu.memory_space<vmem>>) attributes {dimension_semantics = [#tpu.dimension_semantics<parallel>], iteration_bounds = array<i64: 1>, scalar_prefetch = 0 : i64, scratch_operands = 0 : i64, tpu.core_type = #tpu.core_type<tc>, window_params = [{transform_indices = @transform_0, window_bounds = array<i64: 8, 16>}, {transform_indices = @transform_1, window_bounds = array<i64: 8, 16>}, {pipeline_mode = #tpu.pipeline_mode<synchronous>, transform_indices = @transform_2, window_bounds = array<i64: 16, 32>}, {pipeline_mode = #tpu.pipeline_mode<synchronous>, transform_indices = @transform_3, window_bounds = array<i64: 1, 32>}, {pipeline_mode = #tpu.pipeline_mode<synchronous>, transform_indices = @transform_4, window_bounds = array<i64: 32, 32>}, {pipeline_mode = #tpu.pipeline_mode<synchronous>, transform_indices = @transform_5, window_bounds = array<i64: 1, 32>}, {pipeline_mode = #tpu.pipeline_mode<synchronous>, transform_indices = @transform_6, window_bounds = array<i64: 16, 32>}, {pipeline_mode = #tpu.pipeline_mode<synchronous>, transform_indices = @transform_7, window_bounds = array<i64: 1, 32>}, {pipeline_mode = #tpu.pipeline_mode<synchronous>, transform_indices = @transform_8, window_bounds = array<i64: 32, 32>}, {pipeline_mode = #tpu.pipeline_mode<synchronous>, transform_indices = @transform_9, window_bounds = array<i64: 1, 32>}, {transform_indices = @transform_10, window_bounds = array<i64: 8, 64>}]} {
    %c0 = arith.constant 0 : index
    %c0_0 = arith.constant 0 : index
    %0 = vector.load %arg1[%c0, %c0_0] : memref<8x16xbf16, #tpu.memory_space<vmem>>, vector<8x16xbf16>
    %c0_1 = arith.constant 0 : index
    %c0_2 = arith.constant 0 : index
    %1 = vector.load %arg3[%c0_1, %c0_2] : memref<16x32xbf16, #tpu.memory_space<vmem>>, vector<16x32xbf16>
    %cst = arith.constant dense<0.000000e+00> : vector<8x32xf32>
    %2 = tpu.matmul %0, %1, %cst {dimension_numbers = #tpu.dot_dimension_numbers<[1], [0], [0], [1], [0, 0, 1, 1], [], []>} : vector<8x16xbf16>, vector<16x32xbf16>, vector<8x32xf32> -> vector<8x32xf32>
    %c0_3 = arith.constant 0 : index
    %c0_4 = arith.constant 0 : index
    %3 = vector.load %arg4[%c0_3, %c0_4] : memref<1x32xf32, #tpu.memory_space<vmem>>, vector<1x32xf32>
    %4 = vector.broadcast %3 : vector<1x32xf32> to vector<8x32xf32>
    %5 = arith.addf %2, %4 : vector<8x32xf32>
    %cst_5 = arith.constant 0.000000e+00 : f32
    %6 = vector.broadcast %cst_5 : f32 to vector<8x32xf32>
    %7 = arith.maximumf %5, %6 : vector<8x32xf32>
    %8 = arith.truncf %7 : vector<8x32xf32> to vector<8x32xbf16>
    %c0_6 = arith.constant 0 : index
    %c0_7 = arith.constant 0 : index
    %9 = vector.load %arg5[%c0_6, %c0_7] : memref<32x32xbf16, #tpu.memory_space<vmem>>, vector<32x32xbf16>
    %cst_8 = arith.constant dense<0.000000e+00> : vector<8x32xf32>
    %10 = tpu.matmul %8, %9, %cst_8 {dimension_numbers = #tpu.dot_dimension_numbers<[1], [0], [0], [1], [0, 0, 1, 1], [], []>} : vector<8x32xbf16>, vector<32x32xbf16>, vector<8x32xf32> -> vector<8x32xf32>
    %c0_9 = arith.constant 0 : index
    %c0_10 = arith.constant 0 : index
    %11 = vector.load %arg6[%c0_9, %c0_10] : memref<1x32xf32, #tpu.memory_space<vmem>>, vector<1x32xf32>
    %12 = vector.broadcast %11 : vector<1x32xf32> to vector<8x32xf32>
    %13 = arith.addf %10, %12 : vector<8x32xf32>
    %14 = vector.extract_strided_slice %13 {offsets = [0, 0], sizes = [8, 16], strides = [1, 1]} : vector<8x32xf32> to vector<8x16xf32>
    %15 = vector.extract_strided_slice %13 {offsets = [0, 16], sizes = [8, 16], strides = [1, 1]} : vector<8x32xf32> to vector<8x16xf32>
    %c0_11 = arith.constant 0 : index
    %c0_12 = arith.constant 0 : index
    %16 = vector.load %arg2[%c0_11, %c0_12] : memref<8x16xbf16, #tpu.memory_space<vmem>>, vector<8x16xbf16>
    %17 = arith.extf %16 : vector<8x16xbf16> to vector<8x16xf32>
    %cst_13 = arith.constant 5.000000e-01 : f32
    %18 = vector.broadcast %cst_13 : f32 to vector<8x16xf32>
    %19 = arith.mulf %15, %18 : vector<8x16xf32>
    %20 = math.exp %19 : vector<8x16xf32>
    %21 = arith.mulf %20, %17 : vector<8x16xf32>
    %22 = arith.addf %14, %21 : vector<8x16xf32>
    %23 = arith.truncf %22 : vector<8x16xf32> to vector<8x16xbf16>
    %c0_14 = arith.constant 0 : index
    %c0_15 = arith.constant 0 : index
    %24 = vector.load %arg7[%c0_14, %c0_15] : memref<16x32xbf16, #tpu.memory_space<vmem>>, vector<16x32xbf16>
    %cst_16 = arith.constant dense<0.000000e+00> : vector<8x32xf32>
    %25 = tpu.matmul %23, %24, %cst_16 {dimension_numbers = #tpu.dot_dimension_numbers<[1], [0], [0], [1], [0, 0, 1, 1], [], []>} : vector<8x16xbf16>, vector<16x32xbf16>, vector<8x32xf32> -> vector<8x32xf32>
    %c0_17 = arith.constant 0 : index
    %c0_18 = arith.constant 0 : index
    %26 = vector.load %arg8[%c0_17, %c0_18] : memref<1x32xf32, #tpu.memory_space<vmem>>, vector<1x32xf32>
    %27 = vector.broadcast %26 : vector<1x32xf32> to vector<8x32xf32>
    %28 = arith.addf %25, %27 : vector<8x32xf32>
    %cst_19 = arith.constant 0.000000e+00 : f32
    %29 = vector.broadcast %cst_19 : f32 to vector<8x32xf32>
    %30 = arith.maximumf %28, %29 : vector<8x32xf32>
    %31 = arith.truncf %30 : vector<8x32xf32> to vector<8x32xbf16>
    %c0_20 = arith.constant 0 : index
    %c0_21 = arith.constant 0 : index
    %32 = vector.load %arg9[%c0_20, %c0_21] : memref<32x32xbf16, #tpu.memory_space<vmem>>, vector<32x32xbf16>
    %cst_22 = arith.constant dense<0.000000e+00> : vector<8x32xf32>
    %33 = tpu.matmul %31, %32, %cst_22 {dimension_numbers = #tpu.dot_dimension_numbers<[1], [0], [0], [1], [0, 0, 1, 1], [], []>} : vector<8x32xbf16>, vector<32x32xbf16>, vector<8x32xf32> -> vector<8x32xf32>
    %c0_23 = arith.constant 0 : index
    %c0_24 = arith.constant 0 : index
    %34 = vector.load %arg10[%c0_23, %c0_24] : memref<1x32xf32, #tpu.memory_space<vmem>>, vector<1x32xf32>
    %35 = vector.broadcast %34 : vector<1x32xf32> to vector<8x32xf32>
    %36 = arith.addf %33, %35 : vector<8x32xf32>
    %37 = tpu.concatenate %13, %36 in 1 : vector<8x32xf32>, vector<8x32xf32> -> vector<8x64xf32>
    %c0_25 = arith.constant 0 : index
    %c0_26 = arith.constant 0 : index
    %38 = vector.load %arg11[%c0_25, %c0_26] : memref<8x64xf32, #tpu.memory_space<vmem>>, vector<8x64xf32>
    tpu.vector_store %arg11[%c0_25, %c0_26], %37 {strides = array<i32>} : memref<8x64xf32, #tpu.memory_space<vmem>>, vector<8x64xf32>,
    return
  }
  func.func @transform_0(%arg0: i32) -> (i32, i32) {
    %c0_i32 = arith.constant 0 : i32
    %c0_i32_0 = arith.constant 0 : i32
    return %arg0, %c0_i32 : i32, i32
  }
  func.func @transform_1(%arg0: i32) -> (i32, i32) {
    %c0_i32 = arith.constant 0 : i32
    %c0_i32_0 = arith.constant 0 : i32
    return %arg0, %c0_i32 : i32, i32
  }
  func.func @transform_2(%arg0: i32) -> (i32, i32) {
    %c0_i32 = arith.constant 0 : i32
    %c0_i32_0 = arith.constant 0 : i32
    %c0_i32_1 = arith.constant 0 : i32
    return %c0_i32, %c0_i32_0 : i32, i32
  }
  func.func @transform_3(%arg0: i32) -> (i32, i32) {
    %c0_i32 = arith.constant 0 : i32
    %c0_i32_0 = arith.constant 0 : i32
    %c0_i32_1 = arith.constant 0 : i32
    return %c0_i32, %c0_i32_0 : i32, i32
  }
  func.func @transform_4(%arg0: i32) -> (i32, i32) {
    %c0_i32 = arith.constant 0 : i32
    %c0_i32_0 = arith.constant 0 : i32
    %c0_i32_1 = arith.constant 0 : i32
    return %c0_i32, %c0_i32_0 : i32, i32
  }
  func.func @transform_5(%arg0: i32) -> (i32, i32) {
    %c0_i32 = arith.constant 0 : i32
    %c0_i32_0 = arith.constant 0 : i32
    %c0_i32_1 = arith.constant 0 : i32
    return %c0_i32, %c0_i32_0 : i32, i32
  }
  func.func @transform_6(%arg0: i32) -> (i32, i32) {
    %c0_i32 = arith.constant 0 : i32
    %c0_i32_0 = arith.constant 0 : i32
    %c0_i32_1 = arith.constant 0 : i32
    return %c0_i32, %c0_i32_0 : i32, i32
  }
  func.func @transform_7(%arg0: i32) -> (i32, i32) {
    %c0_i32 = arith.constant 0 : i32
    %c0_i32_0 = arith.constant 0 : i32
    %c0_i32_1 = arith.constant 0 : i32
    return %c0_i32, %c0_i32_0 : i32, i32
  }
  func.func @transform_8(%arg0: i32) -> (i32, i32) {
    %c0_i32 = arith.constant 0 : i32
    %c0_i32_0 = arith.constant 0 : i32
    %c0_i32_1 = arith.constant 0 : i32
    return %c0_i32, %c0_i32_0 : i32, i32
  }
  func.func @transform_9(%arg0: i32) -> (i32, i32) {
    %c0_i32 = arith.constant 0 : i32
    %c0_i32_0 = arith.constant 0 : i32
    %c0_i32_1 = arith.constant 0 : i32
    return %c0_i32, %c0_i32_0 : i32, i32
  }
  func.func @transform_10(%arg0: i32) -> (i32, i32) {
    %c0_i32 = arith.constant 0 : i32
    %c0_i32_0 = arith.constant 0 : i32
    return %arg0, %c0_i32 : i32, i32
  }
}

</mosaic_0001>

<bundles_post_ra>
// kernel: tpu_custom_call.1
= control target key start
LH: loop header
LB: loop body
LE: loop exit
PB: predicated region body
PF: predicated region fallthrough
CT: control target
= control target key end

     0   :  { %15 = vsyncpa [#allocation3], 0  ;;  %s640_s0 = inlined_call_operand.hbm [shape: bf16[8,16], index: 0, kind: input, shape index: {}]   ;;  %s641_s1 = inlined_call_operand.hbm [shape: bf16[8,16], index: 1, kind: input, shape index: {}]   ;;  %s642_s2 = inlined_call_operand.hbm [shape: bf16[16,32], index: 2, kind: input, shape index: {}]   ;;  %s643_s3 = inlined_call_operand.vmem [shape: f32[1,32], index: 3, kind: input, shape index: {}]   ;;  %s644_s4 = inlined_call_operand.hbm [shape: bf16[32,32], index: 4, kind: input, shape index: {}]   ;;  %s645_s5 = inlined_call_operand.vmem [shape: f32[1,32], index: 5, kind: input, shape index: {}]   ;;  %s646_s6 = inlined_call_operand.hbm [shape: bf16[16,32], index: 6, kind: input, shape index: {}]   ;;  %s647_s7 = inlined_call_operand.vmem [shape: f32[1,32], index: 7, kind: input, shape index: {}]   ;;  %s648_s8 = inlined_call_operand.hbm [shape: bf16[32,32], index: 8, kind: input, shape index: {}]   ;;  %s649_s9 = inlined_call_operand.vmem [shape: f32[1,32], index: 9, kind: input, shape index: {}]   ;;  %s650_s10 = inlined_call_operand.hbm [shape: f32[8,64], index: 10, kind: output, shape index: {}]  }
   0x1   :  { %16 = vsyncpa [#allocation6], 0 }
   0x2   :  { %17 = vsyncpa [#allocation9], 0 }
   0x3   :  { %18 = vsyncpa [#allocation12], 0  ;;  %s36_s15 = sshll.u32 %s641_s1, 4  ;;  %s37_s15 = int_to_ptr.hbm [resolvable:$true] %s36_s15 }
   0x4   :  { %19 = vsyncpa [#allocation4], 0  ;;  %s535_s16 = smov [#allocation5]   ;;  %s61_s20 = sshll.u32 %s644_s4, 4  ;;  %s62_s20 = int_to_ptr.hbm [resolvable:$true] %s61_s20 }
   0x5   :  { %s38_s17 = sshll.u32 %s535_s16, 4  ;;  %s536_s21 = smov [#allocation8]   ;;  %s39_s17 = int_to_ptr.vmem [resolvable:$true] %s38_s17 }
   0x6   :  { %41 = dma.hbm_to_vmem [thread:$0]  %s37_s15, 64, %s39_s17, [#allocation6]  }
   0x7   :  { %s63_s22 = sshll.u32 %s536_s21, 4  ;;  %s25_s25 = sshll.u32 %s640_s0, 4  ;;  %s64_s22 = int_to_ptr.vmem [resolvable:$true] %s63_s22  ;;  %s26_s25 = int_to_ptr.hbm [resolvable:$true] %s25_s25 }
   0x8   :  { %s537_s1 = smov 64   ;;  %s538_s26 = smov 4  }
   0x9   :  { %69 = dma.hbm_to_vmem [thread:$0]  %s62_s20, 256, %s64_s22, [#allocation9], %s537_s1, %s537_s1, %s538_s26  }
   0xa   :  { %s46_s29 = sshll.u32 %s642_s2, 4  ;;  %s539_s30 = smov [#allocation2]   ;;  %s47_s29 = int_to_ptr.hbm [resolvable:$true] %s46_s29 }
   0xb   :  { %s27_s11 = sshll.u32 %s539_s30, 4  ;;  %s540_s4 = smov [#allocation7]   ;;  %s28_s11 = int_to_ptr.vmem [resolvable:$true] %s27_s11 }
   0xc   :  { %30 = dma.hbm_to_vmem [thread:$0]  %s26_s25, 64, %s28_s11, [#allocation3]  }
   0xd   :  { %s48_s12 = sshll.u32 %s540_s4, 4  ;;  %s76_s0 = sshll.u32 %s646_s6, 4  ;;  %s49_s12 = int_to_ptr.vmem [resolvable:$true] %s48_s12  ;;  %s77_s0 = int_to_ptr.hbm [resolvable:$true] %s76_s0 }
   0xe   :  { %54 = dma.hbm_to_vmem [thread:$0]  %s47_s29, 128, %s49_s12, [#allocation6], %s537_s1, %s537_s1, %s538_s26  }
   0xf   :  { %s91_s17 = sshll.u32 %s648_s8, 4  ;;  %s541_s18 = smov [#allocation10]   ;;  %s92_s17 = int_to_ptr.hbm [resolvable:$true] %s91_s17 }
  0x10   :  { %s78_s2 = sshll.u32 %s541_s18, 4  ;;  %s542_s19 = smov [#allocation11]   ;;  %s79_s2 = int_to_ptr.vmem [resolvable:$true] %s78_s2 }
  0x11   :  { %84 = dma.hbm_to_vmem [thread:$0]  %s77_s0, 128, %s79_s2, [#allocation9], %s537_s1, %s537_s1, %s538_s26  }
  0x12   :  { %s93_s20 = sshll.u32 %s542_s19, 4  ;;  %s94_s20 = int_to_ptr.vmem [resolvable:$true] %s93_s20 }
  0x13   :  { %99 = dma.hbm_to_vmem [thread:$0]  %s92_s17, 256, %s94_s20, [#allocation12], %s537_s1, %s537_s1, %s538_s26  }
  0x14   :  { %525 = dma.done.wait [#allocation3], 64  }
  0x15   :  { %526 = vsyncadd [#allocation3], 4294967232 }
  0x16   :  { %527 = dma.done.wait [#allocation6], 192  }
  0x17   :  { %528 = vsyncadd [#allocation6], 4294967104 }
  0x18   :  { %529 = dma.done.wait [#allocation9], 384  }
  0x19   :  { %530 = vsyncadd [#allocation9], 4294966912 }
  0x1a   :  { %531 = dma.done.wait [#allocation12], 256  }
  0x1b   :  { %532 = vsyncadd [#allocation12], 4294967040  ;;  %v333_v0 = vld [vmem:[#allocation7] sm:$0xff]  ;;  %v127_v1 = vld [vmem:[#allocation2] sm:$0xf]  ;;  %vm140_vm0 = vcmask 130048  }
  0x1c   :  { %151 = vmatpush.bf16.msra.mxu0 %v333_v0  ;;  %v335_v2 = vld [vmem:[#allocation8 + $0x8] sm:$0xff]  ;;  %v334_v3 = vld [vmem:[#allocation8] sm:$0xff]  ;;  %v196_v4 = vld [vmem:[#allocation5] sm:$0xf]  ;;  %s543_s6 = smov 16   ;;  %vm179_vm1 = vcmask 261120  }
  0x1d   :  { %189 = vmatpush.bf16.msra.mxu1 %v335_v2  ;;  %v197_v5 = vunpack.c.l.bf16 %v196_v4  ;;  %v351_v6 = vld [vmem:[%s643_s3] ss:$0 sm:$0xff]  ;;  %s544_s3 = smov 112   ;;  %v338_v25 = vld [vmem:[#allocation11 + $0x8] sm:$0xff]  ;;  %v337_v26 = vld [vmem:[#allocation11] sm:$0xff]  ;;  %s545_s26 = smov 32  }
  0x1e   :  { %v352_v12 = vld [vmem:[%s645_s5] ss:$0 sm:$0xff]  ;;  %271 = vmatpush.bf16.msra.mxu3 %v338_v25  ;;  %s546_s27 = smov [#allocation13]   ;;  %s292_s30 = sshll.u32 %s650_s10, 4  ;;  %vm283_vm2 = vcmask 523264   ;;  %s293_s30 = int_to_ptr.hbm [resolvable:$true] %s292_s30 }
  0x1f   :  { %309 = vmatmul.msk.bf16.vlgmr.msra.gmra.mxu0 %vm140_vm0, %v127_v1  ;;  %202 = vrot.lane.b32.xlu0 %v197_v5, %s543_s6  ;;  %v336_v21 = vld [vmem:[#allocation10] sm:$0xff]  ;;  %s290_s28 = sshll.u32 %s546_s27, 4  ;;  %s291_s28 = int_to_ptr.vmem [resolvable:$true] %s290_s28 }
  0x20   :  { %234 = vmatpush.bf16.msra.mxu2 %v336_v21  ;;  %v353_v27 = vld [vmem:[%s647_s7] ss:$0 sm:$0xff] }
  0x21   :  { %190 = vmatpush.bf16.msra.mxu1 %v334_v3  ;;  %v354_v33 = vld [vmem:[%s649_s9] ss:$0 sm:$0xff] }
  0x22   :  { %272 = vmatpush.bf16.msra.mxu3 %v337_v26 }
  0x91   :  { %v203_v18 = vpop.permute.xlu0 %202 }
  0x9c   :  { %v153_v7 = vpop.f32.mrf.mxu0 }
  0x9d   :  { %v154_v8 = vadd.f32 %v351_v6, %v153_v7 }
  0x9f   :  { %v157_v9 = vmax.f32 %v154_v8, 0.0 }
  0xa1   :  { %v158_v10 = vpack.c.bf16 %v157_v9, %v157_v9 }
  0xa3   :  { %318 = vmatmul.msk.bf16.vlgmr.msra.gmra.mxu1 %vm179_vm1, %v158_v10 }
  0xa4   :  { %v155_v11 = vpop.f32.mrf.mxu0 }
 0x120   :  { %v192_v13 = vpop.f32.mrf.mxu1 }
 0x121   :  { %v193_v14 = vadd.f32 %v352_v12, %v192_v13 }
 0x123   :  { %v198_v15 = vmul.f32 0.5, %v193_v14 }
 0x125   :  { %v199_v16 = vmul.f32 1.442695, %v198_v15 }
 0x127   :  { %355 = vpow2.f32 %v199_v16 }
 0x128   :  { %v194_v17 = vpop.f32.mrf.mxu1 }
 0x12d   :  { %v356_v19 = vpop.eup %355 }
 0x12e   :  { %v205_v20 = vmul.f32 %v356_v19, %v203_v18 }
 0x130   :  { %207 = vrot.lane.b32.xlu0 %v205_v20, %s544_s3 }
 0x1a2   :  { %v208_v22 = vpop.permute.xlu0 %207 }
 0x1a3   :  { %v210_v23 = vadd.f32 %v208_v22, %v193_v14 }
 0x1a5   :  { %v211_v24 = vpack.c.bf16 %v210_v23, %v210_v23 }
 0x1a7   :  { %323 = vmatmul.msk.bf16.vlgmr.msra.gmra.mxu2 %vm140_vm0, %v211_v24 }
 0x22a   :  { %v236_v28 = vpop.f32.mrf.mxu2 }
 0x22b   :  { %v237_v29 = vadd.f32 %v353_v27, %v236_v28 }
 0x22d   :  { %v240_v30 = vmax.f32 %v237_v29, 0.0 }
 0x22f   :  { %v241_v31 = vpack.c.bf16 %v240_v30, %v240_v30 }
 0x231   :  { %332 = vmatmul.msk.bf16.vlgmr.msra.gmra.mxu3 %vm179_vm1, %v241_v31 }
 0x232   :  { %v238_v32 = vpop.f32.mrf.mxu2 }
 0x2b4   :  { %v274_v34 = vpop.f32.mrf.mxu3 }
 0x2b5   :  { %v275_v35 = vadd.f32 %v354_v33, %v274_v34 }
 0x2b7   :  { %279 = vrot.lane.b32.xlu1 %v275_v35, %s545_s26 }
 0x2bc   :  { %v276_v36 = vpop.f32.mrf.mxu3 }
 0x329   :  { %v280_v37 = vpop.permute.xlu1 %279 }
 0x32a   :  { %v282_v38 = vsel %vm179_vm1, %v193_v14, %v280_v37 }
 0x32b   :  { %284 = vst.msk [vmem:[#allocation13] sm:$0xff] %vm283_vm2, %v282_v38 }
 0x32c   :  { %295 = dma.vmem_to_hbm [thread:$0]  %s291_s28, 128, %s293_s30, [#allocation4]  }
 0x32d   :  { %533 = dma.done.wait [#allocation4], 128  }
 0x32e   :  { %534 = vsyncadd [#allocation4], 4294967168 }
 0x32f   :  { %300 = vsyncpa [#allocation3], 1 }
 0x330   :  { %301 = vsyncpa [#allocation6], 1 }
 0x331   :  { %302 = vsyncpa [#allocation9], 1 }
 0x332   :  { %303 = vsyncpa [#allocation12], 1 }
 0x333   :  { %304 = vsyncpa [#allocation4], 1 }

</bundles_post_ra>
